<compile_context>
chip_gen: v7x
topology: tpu7x:2x2x1
jax: 0.10.0
libtpu: 0.0.40
codegen_flags: <defaults>
</compile_context>

<pallas_src>
import functools

import jax
import jax.numpy as jnp
from jax import lax
from jax.experimental import pallas as pl
from jax.experimental.pallas import tpu as pltpu


# ----------------------------------------------------------------------------
# Pallas kernel: one (batch tile) x (class tile) block of the AMSoftmax head.
# ----------------------------------------------------------------------------
def _amsoftmax_kernel(x_ref, w_ref, lb_ref, o_ref, inv_wn_ref, *, m, s, tn,
                      bf16_matmul):
    j = pl.program_id(0)   # class-tile index (outer, "parallel")
    i = pl.program_id(1)   # batch-tile index (inner, "arbitrary")

    w = w_ref[...]                                         # (D, tn) f32

    # inv ||W[:, c]||_2 (clamped): compute once per class tile, reuse across
    # all batch tiles of this class tile (W's DMA is skipped anyway; this
    # skips the redundant O(D*tn) VPU/XLU work as well).
    @pl.when(i == 0)
    def _():
        wsq = jnp.sum(w * w, axis=0, keepdims=True)        # (1, tn)
        inv_wn_ref[...] = lax.rsqrt(jnp.maximum(wsq, 1e-24))

    x = x_ref[...]                                         # (tb, D) f32
    xsq = jnp.sum(x * x, axis=1, keepdims=True)            # (tb, 1)
    inv_xn = lax.rsqrt(jnp.maximum(xsq, 1e-24))

    # Raw matmul on the MXU; fold the two normalizations into a rank-1 scale
    # of the (tb, tn) output tile instead of normalizing x and W up front.
    if bf16_matmul:
        acc = jnp.dot(x.astype(jnp.bfloat16), w.astype(jnp.bfloat16),
                      preferred_element_type=jnp.float32)
    else:
        acc = jnp.dot(x, w, preferred_element_type=jnp.float32)
    costh = acc * inv_xn * inv_wn_ref[...]                 # (tb, tn)

    # zeros().scatter_(1, lb, m) followed by subtract + s-scale, fused into a
    # single select against a broadcasted-iota class index.
    cls = j * tn + lax.broadcasted_iota(jnp.int32, costh.shape, 1)
    sc = s * costh
    o_ref[...] = jnp.where(cls == lb_ref[...], sc - s * m, sc).astype(o_ref.dtype)


# ----------------------------------------------------------------------------
# Wrapper: tiling / specs / VMEM budget.
# ----------------------------------------------------------------------------
@functools.partial(jax.jit, static_argnames=("m", "s", "bf16_matmul"))
def amsoftmax_pallas(x, W, lb, *, m=0.1, s=30.0, bf16_matmul=False):
    """x: (B, D) f32, W: (D, C) f32, lb: (B,) int -> (B, C) f32."""
    B, D = x.shape
    D2, C = W.shape
    assert D == D2
    assert lb.shape[0] == B

    lb2 = lb.astype(jnp.int32).reshape(B, 1)

    # Batch tile: full extent for small batches, else 256 MXU-aligned rows
    # (fits the 64 MiB v7x VMEM with the class tiling below).  No HBM padding:
    # Pallas masks the partial last block.
    tb = B if B <= 256 else 256
    nb = pl.cdiv(B, tb)
    # Class tile: full extent for small heads, else lane-dense 512 columns
    # (multiple of 128 -> unmasked stores, multiple parallel blocks).
    tn = C if C <= 512 else 512
    nc = pl.cdiv(C, tn)

    # Scoped-VMEM budget: double-buffered x / out tiles + W tile + labels +
    # inv-norm scratch, with 2x headroom for Mosaic internals.
    work_bytes = 4 * (2 * tb * D + 2 * D * tn + 2 * tb * tn + 2 * tb + 8 * tn)
    vmem_limit = int(min(max(2 * work_bytes, 32 << 20), 100 << 20))

    kernel = functools.partial(_amsoftmax_kernel, m=float(m), s=float(s),
                               tn=tn, bf16_matmul=bf16_matmul)

    return pl.pallas_call(
        kernel,
        out_shape=jax.ShapeDtypeStruct((B, C), jnp.float32),
        grid=(nc, nb),                                     # class outer, batch inner
        in_specs=[
            pl.BlockSpec((tb, D), lambda j, i: (i, 0)),    # x batch tile (full D)
            pl.BlockSpec((D, tn), lambda j, i: (0, j)),    # W class tile
            pl.BlockSpec((tb, 1), lambda j, i: (i, 0)),    # labels tile
        ],
        out_specs=pl.BlockSpec((tb, tn), lambda j, i: (i, j)),
        scratch_shapes=[pltpu.VMEM((1, tn), jnp.float32)],  # cached inv ||W col||
        compiler_params=pltpu.CompilerParams(
            dimension_semantics=("parallel", "arbitrary"),
            vmem_limit_bytes=vmem_limit),
    )(x, W, lb2)


# ----------------------------------------------------------------------------
# Pure-JAX reference (mirrors the PyTorch forward exactly).
# ----------------------------------------------------------------------------
def amsoftmax_ref(x, W, lb, m=0.1, s=30.0):
    x_nrm = jnp.maximum(jnp.linalg.norm(x, axis=1, keepdims=True), 1e-12)
    w_nrm = jnp.maximum(jnp.linalg.norm(W, axis=0, keepdims=True), 1e-12)
    costh = (x / x_nrm) @ (W / w_nrm)
    delt = jax.nn.one_hot(lb, W.shape[1], dtype=costh.dtype) * m
    return s * (costh - delt)


if __name__ == "__main__":
    key = jax.random.PRNGKey(0)
    kx, kw, kl = jax.random.split(key, 3)

    B, D, C = 8, 128, 5          # batch, in_feats, n_classes
    m, s = 0.1, 30.0

    x = jax.random.normal(kx, (B, D), jnp.float32)
    # xavier_normal_(gain=1): std = sqrt(2 / (fan_in + fan_out))
    W = jax.random.normal(kw, (D, C), jnp.float32) * jnp.sqrt(2.0 / (D + C))
    lb = jax.random.randint(kl, (B,), 0, C, jnp.int32)

    out = amsoftmax_pallas(x, W, lb, m=m, s=s)
    jax.block_until_ready(out)

    ref = amsoftmax_ref(x, W, lb, m=m, s=s)
    assert out.shape == (B, C), out.shape
    assert bool(jnp.all(jnp.isfinite(out)))
    assert bool(jnp.allclose(out, ref, atol=2e-4, rtol=2e-4)), \
        float(jnp.max(jnp.abs(out - ref)))
    print("KERNEL_OK")
</pallas_src>

<mosaic_0001>
module attributes {stable_mosaic.version = 11 : i64} {
  func.func @_amsoftmax_kernel(%arg0: i32, %arg1: i32, %arg2: memref<8x128xf32, #tpu.memory_space<vmem>>, %arg3: memref<128x5xf32, #tpu.memory_space<vmem>>, %arg4: memref<8x1xi32, #tpu.memory_space<vmem>>, %arg5: memref<8x5xf32, #tpu.memory_space<vmem>>, %arg6: memref<1x5xf32, #tpu.memory_space<vmem>>) attributes {dimension_semantics = [#tpu.dimension_semantics<parallel>, #tpu.dimension_semantics<arbitrary>], iteration_bounds = array<i64: 1, 1>, scalar_prefetch = 0 : i64, scratch_operands = 1 : i64, tpu.core_type = #tpu.core_type<tc>, window_params = [{transform_indices = @transform_0, window_bounds = array<i64: 8, 128>}, {transform_indices = @transform_1, window_bounds = array<i64: 128, 5>}, {transform_indices = @transform_2, window_bounds = array<i64: 8, 1>}, {transform_indices = @transform_3, window_bounds = array<i64: 8, 5>}]} {
    %c0 = arith.constant 0 : index
    %c0_0 = arith.constant 0 : index
    %0 = vector.load %arg3[%c0, %c0_0] : memref<128x5xf32, #tpu.memory_space<vmem>>, vector<128x5xf32>
    %c0_i32 = arith.constant 0 : i32
    %1 = arith.cmpi eq, %arg1, %c0_i32 : i32
    %2 = arith.extui %1 : i1 to i32
    %c0_i32_1 = arith.constant 0 : i32
    %3 = arith.cmpi ne, %2, %c0_i32_1 : i32
    scf.if %3 {
      %30 = arith.mulf %0, %0 : vector<128x5xf32>
      %cst_14 = arith.constant dense<0.000000e+00> : vector<5xf32>
      %31 = vector.multi_reduction <add>, %30, %cst_14 [0] : vector<128x5xf32> to vector<5xf32>
      %32 = vector.shape_cast %31 : vector<5xf32> to vector<1x5xf32>
      %cst_15 = arith.constant 1.000000e-24 : f32
      %33 = vector.broadcast %cst_15 : f32 to vector<1x5xf32>
      %34 = arith.maximumf %32, %33 : vector<1x5xf32>
      %35 = math.rsqrt %34 : vector<1x5xf32>
      %c0_16 = arith.constant 0 : index
      %c0_17 = arith.constant 0 : index
      %36 = vector.load %arg6[%c0_16, %c0_17] : memref<1x5xf32, #tpu.memory_space<vmem>>, vector<1x5xf32>
      tpu.vector_store %arg6[%c0_16, %c0_17], %35 {strides = array<i32>} : memref<1x5xf32, #tpu.memory_space<vmem>>, vector<1x5xf32>,
    } else {
    }
    %c0_2 = arith.constant 0 : index
    %c0_3 = arith.constant 0 : index
    %4 = vector.load %arg2[%c0_2, %c0_3] : memref<8x128xf32, #tpu.memory_space<vmem>>, vector<8x128xf32>
    %5 = arith.mulf %4, %4 : vector<8x128xf32>
    %cst = arith.constant dense<0.000000e+00> : vector<8xf32>
    %6 = vector.multi_reduction <add>, %5, %cst [1] : vector<8x128xf32> to vector<8xf32>
    %7 = vector.shape_cast %6 : vector<8xf32> to vector<8x1xf32>
    %cst_4 = arith.constant 1.000000e-24 : f32
    %8 = vector.broadcast %cst_4 : f32 to vector<8x1xf32>
    %9 = arith.maximumf %7, %8 : vector<8x1xf32>
    %10 = math.rsqrt %9 : vector<8x1xf32>
    %cst_5 = arith.constant dense<0.000000e+00> : vector<8x5xf32>
    %11 = tpu.matmul %4, %0, %cst_5 {dimension_numbers = #tpu.dot_dimension_numbers<[1], [0], [0], [1], [0, 0, 1, 1], [], []>} : vector<8x128xf32>, vector<128x5xf32>, vector<8x5xf32> -> vector<8x5xf32>
    %12 = vector.broadcast %10 : vector<8x1xf32> to vector<8x5xf32>
    %13 = arith.mulf %11, %12 : vector<8x5xf32>
    %c0_6 = arith.constant 0 : index
    %c0_7 = arith.constant 0 : index
    %14 = vector.load %arg6[%c0_6, %c0_7] : memref<1x5xf32, #tpu.memory_space<vmem>>, vector<1x5xf32>
    %15 = vector.broadcast %14 : vector<1x5xf32> to vector<8x5xf32>
    %16 = arith.mulf %13, %15 : vector<8x5xf32>
    %c5_i32 = arith.constant 5 : i32
    %17 = arith.muli %arg0, %c5_i32 : i32
    %18 = tpu.iota {dimensions = array<i32: 1>} : vector<8x5xi32>
    %19 = vector.broadcast %17 : i32 to vector<8x5xi32>
    %20 = arith.addi %19, %18 : vector<8x5xi32>
    %cst_8 = arith.constant 3.000000e+01 : f32
    %21 = vector.broadcast %cst_8 : f32 to vector<8x5xf32>
    %22 = arith.mulf %21, %16 : vector<8x5xf32>
    %c0_9 = arith.constant 0 : index
    %c0_10 = arith.constant 0 : index
    %23 = vector.load %arg4[%c0_9, %c0_10] : memref<8x1xi32, #tpu.memory_space<vmem>>, vector<8x1xi32>
    %24 = vector.broadcast %23 : vector<8x1xi32> to vector<8x5xi32>
    %25 = arith.cmpi eq, %20, %24 : vector<8x5xi32>
    %cst_11 = arith.constant 3.000000e+00 : f32
    %26 = vector.broadcast %cst_11 : f32 to vector<8x5xf32>
    %27 = arith.subf %22, %26 : vector<8x5xf32>
    %28 = arith.select %25, %27, %22 : vector<8x5xi1>, vector<8x5xf32>
    %c0_12 = arith.constant 0 : index
    %c0_13 = arith.constant 0 : index
    %29 = vector.load %arg5[%c0_12, %c0_13] : memref<8x5xf32, #tpu.memory_space<vmem>>, vector<8x5xf32>
    tpu.vector_store %arg5[%c0_12, %c0_13], %28 {strides = array<i32>} : memref<8x5xf32, #tpu.memory_space<vmem>>, vector<8x5xf32>,
    return
  }
  func.func @transform_0(%arg0: i32, %arg1: i32) -> (i32, i32) {
    %c0_i32 = arith.constant 0 : i32
    %c0_i32_0 = arith.constant 0 : i32
    return %arg1, %c0_i32 : i32, i32
  }
  func.func @transform_1(%arg0: i32, %arg1: i32) -> (i32, i32) {
    %c0_i32 = arith.constant 0 : i32
    %c0_i32_0 = arith.constant 0 : i32
    return %c0_i32, %arg0 : i32, i32
  }
  func.func @transform_2(%arg0: i32, %arg1: i32) -> (i32, i32) {
    %c0_i32 = arith.constant 0 : i32
    %c0_i32_0 = arith.constant 0 : i32
    return %arg1, %c0_i32 : i32, i32
  }
  func.func @transform_3(%arg0: i32, %arg1: i32) -> (i32, i32) {
    %c0_i32 = arith.constant 0 : i32
    return %arg1, %arg0 : i32, i32
  }
}

</mosaic_0001>

<bundles_post_ra>
// kernel: amsoftmax_pallas.1
= control target key start
LH: loop header
LB: loop body
LE: loop exit
PB: predicated region body
PF: predicated region fallthrough
CT: control target
= control target key end

     0   :  { %vm51_vm0 = vcmask 39936   ;;  %v319_v3 = vmov 0.0|0.0   ;;  %s435_s0 = inlined_call_operand.vmem [shape: f32[8,128], index: 0, kind: input, shape index: {}]   ;;  %s436_s1 = inlined_call_operand.vmem [shape: f32[128,5], index: 1, kind: input, shape index: {}]   ;;  %s437_s2 = inlined_call_operand.vmem [shape: s32[8,1], index: 2, kind: input, shape index: {}]   ;;  %s438_s3 = inlined_call_operand.hbm [shape: f32[8,5], index: 3, kind: output, shape index: {}]  }
   0x1   :  { %v15_v0 = vld [vmem:[%s436_s1] sm:$0xff]  ;;  %v16_v1 = vld [vmem:[%s436_s1 + $0x8] sm:$0xff]  ;;  %v17_v2 = vld [vmem:[%s436_s1 + $0x10] sm:$0xff]  ;;  %261 = vmatprep.subr.bf16.mxu0 %v319_v3 }
   0x2   :  { %v35_v4 = vmul.f32 %v15_v0, %v15_v0  ;;  %v36_v5 = vmul.f32 %v16_v1, %v16_v1  ;;  %v262_v6 = vpack.c.bf16 %v16_v1, %v15_v0  ;;  %v18_v7 = vld [vmem:[%s436_s1 + $0x18] sm:$0xff]  ;;  %v37_v8 = vmul.f32 %v17_v2, %v17_v2  ;;  %v19_v11 = vld [vmem:[%s436_s1 + $0x20] sm:$0xff]  ;;  %v20_v17 = vld [vmem:[%s436_s1 + $0x28] sm:$0xff] }
   0x3   :  { %v38_v9 = vmul.f32 %v18_v7, %v18_v7  ;;  %v265_v10 = vpack.c.bf16 %v18_v7, %v17_v2  ;;  %v39_v15 = vmul.f32 %v19_v11, %v19_v11  ;;  %v40_v19 = vmul.f32 %v20_v17, %v20_v17  ;;  %v21_v21 = vld [vmem:[%s436_s1 + $0x30] sm:$0xff] }
   0x4   :  { %v52_v12 = vsel %vm51_vm0, %v35_v4, 0.0  ;;  %v53_v13 = vsel %vm51_vm0, %v36_v5, 0.0  ;;  %263 = vmatpush3.bf16.msra.mxu0 %v262_v6  ;;  %v55_v14 = vsel %vm51_vm0, %v37_v8, 0.0 }
   0x5   :  { %v54_v16 = vadd.f32 %v53_v13, %v52_v12  ;;  %264 = vmatprep.subr.bf16.mxu0 %v319_v3  ;;  %v57_v18 = vsel %vm51_vm0, %v38_v9, 0.0 }
   0x7   :  { %v56_v20 = vadd.f32 %v55_v14, %v54_v16 }
   0x8   :  { %8 = vsyncpa [#allocation4], 0  ;;  %266 = vmatpush3.bf16.msra.mxu0 %v265_v10  ;;  %v59_v22 = vsel %vm51_vm0, %v39_v15, 0.0  ;;  %v268_v23 = vpack.c.bf16 %v20_v17, %v19_v11  ;;  %v22_v24 = vld [vmem:[%s436_s1 + $0x38] sm:$0xff]  ;;  %v41_v25 = vmul.f32 %v21_v21, %v21_v21  ;;  %v61_v27 = vsel %vm51_vm0, %v40_v19, 0.0  ;;  %v23_v31 = vld [vmem:[%s436_s1 + $0x40] sm:$0xff] }
   0x9   :  { %v58_v26 = vadd.f32 %v57_v18, %v56_v20  ;;  %267 = vmatprep.subr.bf16.mxu0 %v319_v3  ;;  %v42_v28 = vmul.f32 %v22_v24, %v22_v24  ;;  %v271_v30 = vpack.c.bf16 %v22_v24, %v21_v21  ;;  %v43_v33 = vmul.f32 %v23_v31, %v23_v31  ;;  %v93_v34 = vld [vmem:[%s435_s0] sm:$0xff]  ;;  %v24_v36 = vld [vmem:[%s436_s1 + $0x48] sm:$0xff]  ;;  %v25_v42 = vld [vmem:[%s436_s1 + $0x50] sm:$0xff] }
   0xa   :  { %v63_v32 = vsel %vm51_vm0, %v41_v25, 0.0  ;;  %vm320_vm1 = vmmov 0   ;;  %v321_v37 = vmov 0.0   ;;  %v94_v38 = vmul.f32 %v93_v34, %v93_v34  ;;  %v26_v48 = vld [vmem:[%s436_s1 + $0x58] sm:$0xff]  ;;  %v27_v52 = vld [vmem:[%s436_s1 + $0x60] sm:$0xff]  ;;  %v28_v57 = vld [vmem:[%s436_s1 + $0x68] sm:$0xff] }
   0xb   :  { %v60_v29 = vadd.f32 %v59_v22, %v58_v26  ;;  %258 = vmatprep.mubr.msk.f32.mxu0 %vm320_vm1, %v321_v37  ;;  %v65_v39 = vsel %vm51_vm0, %v42_v28, 0.0  ;;  %v44_v40 = vmul.f32 %v24_v36, %v24_v36  ;;  %v67_v43 = vsel %vm51_vm0, %v43_v33, 0.0  ;;  %v29_v61 = vld [vmem:[%s436_s1 + $0x70] sm:$0xff]  ;;  %v30_v2 = vld [vmem:[%s436_s1 + $0x78] sm:$0xff]  ;;  %v184_v13 = vld [vmem:[%s437_s2] sm:$0xff]  ;;  %s323_s1 = smov [#allocation3]  }
   0xc   :  { %269 = vmatpush3.bf16.msra.mxu0 %v268_v23  ;;  %95 = vadd.xlane.f32.xlu0 %v94_v38  ;;  %v274_v44 = vpack.c.bf16 %v24_v36, %v23_v31  ;;  %v45_v45 = vmul.f32 %v25_v42, %v25_v42  ;;  %v322_v46 = vmov 0   ;;  %v46_v50 = vmul.f32 %v26_v48, %v26_v48  ;;  %s199_s2 = sshll.u32 %s323_s1, 4  ;;  %s200_s2 = int_to_ptr.vmem [resolvable:$true] %s199_s2 }
   0xd   :  { %v62_v35 = vadd.f32 %v61_v27, %v60_v29  ;;  %270 = vmatprep.subr.bf16.mxu0 %v319_v3  ;;  %290 = vset.pattern.permute.xlu0 %v322_v46  ;;  %v69_v49 = vsel %vm51_vm0, %v44_v40, 0.0  ;;  %v277_v54 = vpack.c.bf16 %v26_v48, %v25_v42  ;;  %v47_v55 = vmul.f32 %v27_v52, %v27_v52  ;;  %s295_s20 = scalar_lea.vmem %s200_s2, 128  ;;  %p300_p1 = scmp.lt.s32.totalorder %s200_s2, %s200_s2 }
   0xe   :  { %v71_v53 = vsel %vm51_vm0, %v45_v45, 0.0  ;;  %v73_v58 = vsel %vm51_vm0, %v46_v50, 0.0  ;;  %v48_v59 = vmul.f32 %v28_v57, %v28_v57  ;;  %v280_v63 = vpack.c.bf16 %v28_v57, %v27_v52  ;;  %p296_p0 = scmp.ne.s32.totalorder %s200_s2, %s295_s20  ;;  %p301_p2 = scmp.lt.s32.totalorder %s295_s20, %s295_s20 }
   0xf   :  { %v64_v41 = vadd.f32 %v63_v32, %v62_v35  ;;  %v75_v62 = vsel %vm51_vm0, %v47_v55, 0.0  ;;  %v49_v0 = vmul.f32 %v29_v61, %v29_v61  ;;  %v50_v5 = vmul.f32 %v30_v2, %v30_v2 }
  0x10   :  { %272 = vmatpush3.bf16.msra.mxu0 %v271_v30  ;;  %v77_v4 = vsel %vm51_vm0, %v48_v59, 0.0  ;;  %v283_v8 = vpack.c.bf16 %v30_v2, %v29_v61  ;;  %vm91_vm2 = vcmask 32768   ;;  %v179_v24 = vlaneseq  ;;  %p302_p3 = por %p301_p2, %p300_p1 }
  0x11   :  { %v66_v47 = vadd.f32 %v65_v39, %v64_v41  ;;  %273 = vmatprep.subr.bf16.mxu0 %v319_v3  ;;  %v79_v7 = vsel %vm51_vm0, %v49_v0, 0.0  ;;  %v81_v10 = vsel %vm51_vm0, %v50_v5, 0.0 }
  0x12   :  { %v180_v29 = vand.u32 127, %v179_v24  ;;  %p303_p4 = pnand %p302_p3, %p296_p0 }
  0x13   :  { %v68_v51 = vadd.f32 %v67_v43, %v66_v47 }
  0x14   :  { %275 = vmatpush3.bf16.msra.mxu0 %v274_v44 }
  0x15   :  { %v70_v56 = vadd.f32 %v69_v49, %v68_v51  ;;  %276 = vmatprep.subr.bf16.mxu0 %v319_v3 }
  0x17   :  { %v72_v60 = vadd.f32 %v71_v53, %v70_v56 }
  0x18   :  { %278 = vmatpush3.bf16.msra.mxu0 %v277_v54 }
  0x19   :  { %v74_v1 = vadd.f32 %v73_v58, %v72_v60  ;;  %279 = vmatprep.subr.bf16.mxu0 %v319_v3 }
  0x1b   :  { %v76_v6 = vadd.f32 %v75_v62, %v74_v1 }
  0x1c   :  { %281 = vmatpush3.bf16.msra.mxu0 %v280_v63 }
  0x1d   :  { %v78_v9 = vadd.f32 %v77_v4, %v76_v6  ;;  %282 = vmatprep.subr.bf16.mxu0 %v319_v3 }
  0x1f   :  { %v80_v11 = vadd.f32 %v79_v7, %v78_v9 }
  0x20   :  { %284 = vmatpush3.bf16.msra.mxu0 %v283_v8 }
  0x21   :  { %v82_v12 = vadd.f32 %v81_v10, %v80_v11 }
  0x22   :  { %186 = vperm.xlu0 %290, %v184_v13  }
  0x23   :  { %v83_v14 = vrot.slane %v82_v12, 4  ;;  %259 = vmatmul.mubr.f32.vlgmr.msra.gmra.mrb[0].mxu0 %v93_v34 }
  0x25   :  { %v84_v15 = vadd.f32 %v83_v14, %v82_v12 }
  0x27   :  { %v85_v16 = vrot.slane %v84_v15, 2 }
  0x29   :  { %v86_v17 = vadd.f32 %v85_v16, %v84_v15 }
  0x2b   :  { %v87_v18 = vrot.slane %v86_v17, 1 }
  0x2d   :  { %v88_v19 = vadd.f32 %v87_v18, %v86_v17 }
  0x2f   :  { %v89_v20 = vmax.f32 %v88_v19, 1e-24 }
  0x31   :  { %291 = vrsqrt.f32 %v89_v20 }
  0x3b   :  { %v292_v3 = vpop.eup %291 }
  0x3c   :  { %92 = vst.msk [vmem:[#allocation2] sm:$0x1] %vm91_vm2, %v292_v3 }
  0x43   :  { %v207_v26 = vld [vmem:[#allocation2] ss:$0 sm:$0xff] }
  0x99   :  { %v96_v21 = vpop.xlane.xlu0 %95 }
  0x9a   :  { %v97_v22 = vmax.f32 %v96_v21, 1e-24 }
  0x9c   :  { %293 = vrsqrt.f32 %v97_v22 }
  0xa1   :  { %v187_v31 = vpop.permute.xlu0 %186 }
  0xa2   :  { %vm188_vm3 = vcmp.eq.s32.totalorder %v180_v29, %v187_v31 }
  0xa6   :  { %v294_v23 = vpop.eup %293 }
  0xf6   :  { %v165_v25 = vpop.f32.mrb[0].mxu0 }
  0xf7   :  { %v169_v27 = vmul.f32 %v294_v23, %v165_v25  ;;  %v260_v28 = vpop.f32.mrb[1].mxu0 }
  0xf9   :  { %v177_v30 = vmul.f32 %v207_v26, %v169_v27 }
  0xfb   :  { %v183_v32 = vmul.f32 30.0, %v177_v30 }
  0xfd   :  { %v208_v33 = vadd.f32 -3.0, %v183_v32 }
  0xff   :  { %v190_v34 = vsel %vm188_vm3, %v208_v33, %v183_v32 }
 0x100   :  { %192 = vst.msk [vmem:[#allocation3] sm:$0xff] %vm51_vm0, %v190_v34 }
 0x101   :  { %306 = shalt.err (!%p303_p4)
}
 0x102   :  { %s307_s23 = scalar_lea.hbm %s438_s3, 128 }
 0x103   :  { %p308_p5 = scmp.ne.s32.totalorder %s438_s3, %s307_s23  ;;  %p311_p6 = scmp.lt.u32.totalorder %s307_s23, %s438_s3 }
 0x105   :  { %p313_p7 = pnand %p311_p6, %p308_p5 }
 0x107   :  { %316 = shalt.err (!%p313_p7)
}
 0x108   :  { %202 = dma.vmem_to_hbm [thread:$0]  %s200_s2, 128, %s438_s3, [#allocation4]  }
 0x109   :  { %317 = dma.done.wait [#allocation4], 128  }
 0x10a   :  { %318 = vsyncadd [#allocation4], 4294967168 }
 0x10b   :  { %206 = vsyncpa [#allocation4], 1 }

</bundles_post_ra>
